<compile_context>
chip_gen: v7x
topology: tpu7x:2x2x1
jax: 0.10.0
libtpu: 0.0.40
codegen_flags: <defaults>
</compile_context>

<pallas_src>
import jax
import jax.numpy as jnp
from jax.experimental import pallas as pl
from jax.experimental.pallas import tpu as pltpu


def _linear_kernel(x_ref, wt_ref, b_ref, o_ref):
    # x_ref:  (B, IN)    activations
    # wt_ref: (IN, OUT)  weight, pre-transposed at init to (in, out) layout
    # b_ref:  (1, OUT)   bias row, broadcast over batch
    # o_ref:  (B, OUT)   output block
    y = jnp.dot(x_ref[...], wt_ref[...], preferred_element_type=jnp.float32)
    o_ref[...] = (y + b_ref[...]).astype(o_ref.dtype)


def init_linear_params(weight, bias):
    """One-time parameter prep (hoisted out of the per-call path).

    weight: (OUT, IN)  -- PyTorch nn.Linear layout
    bias:   (OUT,)
    returns (wt, b_row) with wt: (IN, OUT), b_row: (1, OUT)
    """
    wt = jnp.asarray(weight).T                 # (IN, OUT) -> single clean MXU pass
    b_row = jnp.asarray(bias).reshape(1, -1)   # (1, OUT)  -> broadcastable row
    return wt, b_row


def linear_forward(x, wt, b_row):
    """Pallas equivalent of nn.Linear(input_size, output_size)(x).

    x:     (B, IN)
    wt:    (IN, OUT)  pre-transposed weight from init_linear_params
    b_row: (1, OUT)
    returns (B, OUT)
    """
    B, IN = x.shape
    IN_w, OUT = wt.shape
    assert IN == IN_w, "weight shape mismatch"

    itemsize = jnp.dtype(x.dtype).itemsize
    cost = pl.CostEstimate(
        flops=2 * B * IN * OUT,
        transcendentals=0,
        bytes_accessed=(B * IN + IN * OUT + OUT + B * OUT) * itemsize,
    )

    # Full-extent blocks (no grid): each operand is one VMEM-resident block.
    vmem_spec = pl.BlockSpec(memory_space=pltpu.MemorySpace.VMEM)

    return pl.pallas_call(
        _linear_kernel,
        out_shape=jax.ShapeDtypeStruct((B, OUT), x.dtype),
        in_specs=[vmem_spec, vmem_spec, vmem_spec],
        out_specs=vmem_spec,
        cost_estimate=cost,
    )(x, wt, b_row)


if __name__ == "__main__":
    # Module config (deterministic, in-script init — no checkpoint load).
    input_size = 8
    output_size = 4
    batch = 16

    key = jax.random.PRNGKey(0)
    kx, kw, kb = jax.random.split(key, 3)

    x = jax.random.normal(kx, (batch, input_size), dtype=jnp.float32)

    # nn.Linear-style init: uniform(-1/sqrt(in), 1/sqrt(in)) for weight & bias.
    bound = 1.0 / (input_size ** 0.5)
    weight = jax.random.uniform(
        kw, (output_size, input_size), dtype=jnp.float32,
        minval=-bound, maxval=bound)
    bias = jax.random.uniform(
        kb, (output_size,), dtype=jnp.float32, minval=-bound, maxval=bound)

    # Parameter prep happens once, outside the per-call path.
    wt, b_row = init_linear_params(weight, bias)

    fwd = jax.jit(linear_forward)
    y = fwd(x, wt, b_row)
    jax.block_until_ready(y)

    # Correctness check against plain-JAX reference.
    y_ref = x @ weight.T + bias
    assert y.shape == (batch, output_size)
    assert jnp.allclose(y, y_ref, atol=1e-5, rtol=1e-5)

    print("KERNEL_OK")
</pallas_src>

<mosaic_0001>
module attributes {stable_mosaic.version = 11 : i64} {
  func.func @_linear_kernel(%arg0: memref<16x8xf32, #tpu.memory_space<vmem>>, %arg1: memref<8x4xf32, #tpu.memory_space<vmem>>, %arg2: memref<1x4xf32, #tpu.memory_space<vmem>>, %arg3: memref<16x4xf32, #tpu.memory_space<vmem>>) attributes {dimension_semantics = [], scalar_prefetch = 0 : i64, scratch_operands = 0 : i64, tpu.core_type = #tpu.core_type<tc>} {
    %c0 = arith.constant 0 : index
    %c0_0 = arith.constant 0 : index
    %0 = vector.load %arg0[%c0, %c0_0] : memref<16x8xf32, #tpu.memory_space<vmem>>, vector<16x8xf32>
    %c0_1 = arith.constant 0 : index
    %c0_2 = arith.constant 0 : index
    %1 = vector.load %arg1[%c0_1, %c0_2] : memref<8x4xf32, #tpu.memory_space<vmem>>, vector<8x4xf32>
    %cst = arith.constant dense<0.000000e+00> : vector<16x4xf32>
    %2 = tpu.matmul %0, %1, %cst {dimension_numbers = #tpu.dot_dimension_numbers<[1], [0], [0], [1], [0, 0, 1, 1], [], []>} : vector<16x8xf32>, vector<8x4xf32>, vector<16x4xf32> -> vector<16x4xf32>
    %c0_3 = arith.constant 0 : index
    %c0_4 = arith.constant 0 : index
    %3 = vector.load %arg2[%c0_3, %c0_4] : memref<1x4xf32, #tpu.memory_space<vmem>>, vector<1x4xf32>
    %4 = vector.broadcast %3 : vector<1x4xf32> to vector<16x4xf32>
    %5 = arith.addf %2, %4 : vector<16x4xf32>
    %c0_5 = arith.constant 0 : index
    %c0_6 = arith.constant 0 : index
    %6 = vector.load %arg3[%c0_5, %c0_6] : memref<16x4xf32, #tpu.memory_space<vmem>>, vector<16x4xf32>
    tpu.vector_store %arg3[%c0_5, %c0_6], %5 {strides = array<i32>} : memref<16x4xf32, #tpu.memory_space<vmem>>, vector<16x4xf32>,
    return
  }
}

</mosaic_0001>

<bundles_post_ra>
// kernel: linear_forward.1
= control target key start
LH: loop header
LB: loop body
LE: loop exit
PB: predicated region body
PF: predicated region fallthrough
CT: control target
= control target key end

     0   :  { %vm24_vm0 = vcmask 64512   ;;  %vm106_vm1 = vcmask 31744   ;;  %s162_s1 = inlined_call_operand.vmem [shape: f32[8,4], index: 1, kind: input, shape index: {}]   ;;  %s163_s0 = inlined_call_operand.vmem [shape: f32[16,8], index: 0, kind: input, shape index: {}]   ;;  %s164_s2 = inlined_call_operand.vmem [shape: f32[1,4], index: 2, kind: input, shape index: {}]   ;;  %s165_s3 = inlined_call_operand.vmem [shape: f32[16,4], index: 3, kind: output, shape index: {}]  }
   0x1   :  { %v16_v0 = vld [vmem:[%s162_s1] sm:$0xff]  ;;  %v15_v2 = vld [vmem:[%s163_s0 + $0x8] sm:$0xff] }
   0x2   :  { %v14_v1 = vld [vmem:[%s163_s0] sm:$0xff]  ;;  %119 = vmatprep.subr.mxu0 %v16_v0 }
   0x3   :  { %121 = vmatprep.mubr.msk.f32.mxu0 %vm24_vm0, %v14_v1  ;;  %120 = vmatpush3.msra.mxu0 %v16_v0  ;;  %v113_v3 = vld [vmem:[%s164_s2] ss:$0 sm:$0xff] }
   0x4   :  { %122 = vmatmul.mubr.msk.f32.vlgmr.msra.gmra.mrb[0].mxu0 %vm24_vm0, %v15_v2 }
  0xd7   :  { %v123_v4 = vpop.f32.mrb[0].mxu0 }
  0xd8   :  { %v103_v5 = vadd.f32 %v123_v4, %v113_v3  ;;  %v97_v6 = vpop.f32.mrb[1].mxu0 }
  0xd9   :  { %v98_v7 = vadd.f32 %v113_v3, %v97_v6 }
  0xda   :  { %108 = vst.msk [vmem:[%s165_s3 + $0x8] sm:$0xff] %vm106_vm1, %v103_v5 }
  0xdb   :  { %107 = vst.msk [vmem:[%s165_s3] sm:$0xff] %vm106_vm1, %v98_v7 }

</bundles_post_ra>
